<compile_context>
chip_gen: v6e
topology: v6e:2x2x1
jax: 0.10.0
libtpu: 0.0.40
codegen_flags: <defaults>
</compile_context>

<pallas_src>
import functools

import jax
import jax.numpy as jnp
from jax.experimental import pallas as pl
from jax.experimental.pallas import tpu as pltpu


_LANES = 128


def _sublane_multiple(dtype) -> int:
    return {4: 8, 2: 16, 1: 32}.get(jnp.dtype(dtype).itemsize, 8)


def _rmse_partial_kernel(pred_ref, true_ref, sumsq_ref, maxabs_ref, *,
                         tile_r, valid_rows):
    k = pl.program_id(0)

    @pl.when(k == 0)
    def _():
        sumsq_ref[...] = jnp.zeros_like(sumsq_ref)
        maxabs_ref[...] = jnp.zeros_like(maxabs_ref)

    diff = pred_ref[...].astype(jnp.float32) - true_ref[...].astype(jnp.float32)
    sq = diff * diff
    ab = jnp.abs(diff)

    def accumulate(sq_t, ab_t):
        # Fold the tile to a single vreg: (tile_r,128) -> (tile_r//8,8,128)
        # and reduce the major axis (pure VALU adds/maxes across vregs).
        sq_f = sq_t.reshape(tile_r // 8, 8, _LANES).sum(axis=0)
        ab_f = ab_t.reshape(tile_r // 8, 8, _LANES).max(axis=0)
        sumsq_ref[...] = sumsq_ref[...] + sq_f
        maxabs_ref[...] = jnp.maximum(maxabs_ref[...], ab_f)

    row0 = k * tile_r
    is_full = row0 + tile_r <= valid_rows  # False only for a trailing partial block

    @pl.when(is_full)
    def _():
        accumulate(sq, ab)  # hot path: no mask

    @pl.when(jnp.logical_not(is_full))
    def _():
        row_ids = row0 + jax.lax.broadcasted_iota(jnp.int32, (tile_r, _LANES), 0)
        valid = row_ids < valid_rows
        accumulate(jnp.where(valid, sq, 0.0), jnp.where(valid, ab, 0.0))


def rmse_loss(pred, true, *, tile_rows=4096):
    """sqrt(mean((pred - true)^2)) / max(|pred - true|)  (scalar float32)."""
    assert pred.shape == true.shape, (pred.shape, true.shape)
    n_total = int(pred.size)
    assert n_total > 0

    sub = max(_sublane_multiple(pred.dtype), _sublane_multiple(true.dtype))

    flat_p = pred.reshape(-1)
    flat_t = true.reshape(-1)

    # Lane-dense layout: (rows, 128).  Pad only up to the next multiple of 128
    # lanes; padded positions are equal in both tensors -> zero diff, so they
    # contribute nothing to sum-of-squares or max|diff|.
    # TODO(synk): an in-kernel lane mask on the final row would remove even
    # this one-time copy for numel not a multiple of 128.
    pad_lane = (-n_total) % _LANES
    rows = (n_total + pad_lane) // _LANES

    req = max(sub, (int(tile_rows) // sub) * sub)
    if rows <= req:
        # Whole input fits in a single full-array block: round the (small)
        # array up to the dtype sublane multiple; no in-kernel mask needed.
        tile_r = rows + ((-rows) % sub)
        rows_p = tile_r
    else:
        # Stream fixed blocks; a trailing partial block is masked in-kernel.
        tile_r = req
        rows_p = rows

    total_pad = rows_p * _LANES - n_total
    if total_pad:
        flat_p = jnp.pad(flat_p, (0, total_pad))
        flat_t = jnp.pad(flat_t, (0, total_pad))
    p2 = flat_p.reshape(rows_p, _LANES)
    t2 = flat_t.reshape(rows_p, _LANES)

    nblocks = pl.cdiv(rows_p, tile_r)

    kernel = functools.partial(_rmse_partial_kernel, tile_r=tile_r,
                               valid_rows=rows_p)

    itemsize = max(jnp.dtype(pred.dtype).itemsize,
                   jnp.dtype(true.dtype).itemsize)
    cost = pl.CostEstimate(
        flops=5 * n_total,
        transcendentals=0,
        bytes_accessed=2 * n_total * itemsize + 2 * 8 * _LANES * 4,
    )

    sumsq_p, maxabs_p = pl.pallas_call(
        kernel,
        out_shape=(jax.ShapeDtypeStruct((8, _LANES), jnp.float32),
                   jax.ShapeDtypeStruct((8, _LANES), jnp.float32)),
        grid_spec=pltpu.PrefetchScalarGridSpec(
            num_scalar_prefetch=0,
            grid=(nblocks,),
            in_specs=[
                pl.BlockSpec((tile_r, _LANES), lambda k: (k, 0)),
                pl.BlockSpec((tile_r, _LANES), lambda k: (k, 0)),
            ],
            out_specs=(
                pl.BlockSpec((8, _LANES), lambda k: (0, 0)),
                pl.BlockSpec((8, _LANES), lambda k: (0, 0)),
            ),
        ),
        compiler_params=pltpu.CompilerParams(
            dimension_semantics=("arbitrary",),
            vmem_limit_bytes=32 * 1024 * 1024,
        ),
        cost_estimate=cost,
    )(p2, t2)

    sumsq = jnp.sum(sumsq_p)
    maxabs = jnp.max(maxabs_p)
    # NOTE: pred == true everywhere -> maxabs == 0 -> inf/nan, matching the
    # PyTorch module's behavior.
    return jnp.sqrt(sumsq / jnp.float32(n_total)) / maxabs


def _reference(pred, true):
    d = (pred.reshape(pred.shape[0], -1)
         - true.reshape(true.shape[0], -1)).astype(jnp.float32)
    return jnp.sqrt(jnp.mean(d * d)) / jnp.max(jnp.abs(d))


if __name__ == "__main__":
    key = jax.random.PRNGKey(0)
    k1, k2, k3, k4, k5, k6 = jax.random.split(key, 6)

    # Shapes consistent with a typical NCHW prediction/target pair.
    pred = jax.random.normal(k1, (2, 4, 16, 16), dtype=jnp.float32)
    true = jax.random.normal(k2, (2, 4, 16, 16), dtype=jnp.float32)
    loss = rmse_loss(pred, true)
    jax.block_until_ready(loss)
    ref = _reference(pred, true)
    assert jnp.allclose(loss, ref, rtol=1e-4, atol=1e-6), (loss, ref)

    # Misaligned numel (not a multiple of 128): single padded block path.
    pred_b = jax.random.normal(k3, (2, 3, 10, 10), dtype=jnp.float32)
    true_b = jax.random.normal(k4, (2, 3, 10, 10), dtype=jnp.float32)
    loss_b = rmse_loss(pred_b, true_b)
    jax.block_until_ready(loss_b)
    ref_b = _reference(pred_b, true_b)
    assert jnp.allclose(loss_b, ref_b, rtol=1e-4, atol=1e-6), (loss_b, ref_b)

    # Multi-block streaming path with a masked trailing partial block.
    pred_c = jax.random.normal(k5, (2, 4, 50, 50), dtype=jnp.float32)
    true_c = jax.random.normal(k6, (2, 4, 50, 50), dtype=jnp.float32)
    loss_c = rmse_loss(pred_c, true_c, tile_rows=64)
    jax.block_until_ready(loss_c)
    ref_c = _reference(pred_c, true_c)
    assert jnp.allclose(loss_c, ref_c, rtol=1e-4, atol=1e-6), (loss_c, ref_c)

    print("KERNEL_OK")
</pallas_src>

<mosaic_0001>
module attributes {stable_mosaic.version = 11 : i64} {
  func.func @_rmse_partial_kernel(%arg0: i32, %arg1: memref<16x128xf32, #tpu.memory_space<vmem>>, %arg2: memref<16x128xf32, #tpu.memory_space<vmem>>, %arg3: memref<8x128xf32, #tpu.memory_space<vmem>>, %arg4: memref<8x128xf32, #tpu.memory_space<vmem>>) attributes {dimension_semantics = [#tpu.dimension_semantics<arbitrary>], iteration_bounds = array<i64: 1>, scalar_prefetch = 0 : i64, scratch_operands = 0 : i64, tpu.core_type = #tpu.core_type<tc>, window_params = [{transform_indices = @transform_0, window_bounds = array<i64: 16, 128>}, {transform_indices = @transform_1, window_bounds = array<i64: 16, 128>}, {pipeline_mode = #tpu.pipeline_mode<synchronous>, transform_indices = @transform_2, window_bounds = array<i64: 8, 128>}, {pipeline_mode = #tpu.pipeline_mode<synchronous>, transform_indices = @transform_3, window_bounds = array<i64: 8, 128>}]} {
    %c0_i32 = arith.constant 0 : i32
    %0 = arith.cmpi eq, %arg0, %c0_i32 : i32
    %1 = arith.extui %0 : i1 to i32
    %c0_i32_0 = arith.constant 0 : i32
    %2 = arith.cmpi ne, %1, %c0_i32_0 : i32
    scf.if %2 {
      %cst = arith.constant 0.000000e+00 : f32
      %16 = vector.broadcast %cst : f32 to vector<8x128xf32>
      %c0_8 = arith.constant 0 : index
      %c0_9 = arith.constant 0 : index
      %17 = vector.load %arg3[%c0_8, %c0_9] : memref<8x128xf32, #tpu.memory_space<vmem>>, vector<8x128xf32>
      tpu.vector_store %arg3[%c0_8, %c0_9], %16 {strides = array<i32>} : memref<8x128xf32, #tpu.memory_space<vmem>>, vector<8x128xf32>,
      %cst_10 = arith.constant 0.000000e+00 : f32
      %18 = vector.broadcast %cst_10 : f32 to vector<8x128xf32>
      %c0_11 = arith.constant 0 : index
      %c0_12 = arith.constant 0 : index
      %19 = vector.load %arg4[%c0_11, %c0_12] : memref<8x128xf32, #tpu.memory_space<vmem>>, vector<8x128xf32>
      tpu.vector_store %arg4[%c0_11, %c0_12], %18 {strides = array<i32>} : memref<8x128xf32, #tpu.memory_space<vmem>>, vector<8x128xf32>,
    } else {
    }
    %c0 = arith.constant 0 : index
    %c0_1 = arith.constant 0 : index
    %3 = vector.load %arg1[%c0, %c0_1] : memref<16x128xf32, #tpu.memory_space<vmem>>, vector<16x128xf32>
    %c0_2 = arith.constant 0 : index
    %c0_3 = arith.constant 0 : index
    %4 = vector.load %arg2[%c0_2, %c0_3] : memref<16x128xf32, #tpu.memory_space<vmem>>, vector<16x128xf32>
    %5 = arith.subf %3, %4 : vector<16x128xf32>
    %6 = arith.mulf %5, %5 : vector<16x128xf32>
    %7 = math.absf %5 : vector<16x128xf32>
    %c16_i32 = arith.constant 16 : i32
    %8 = arith.muli %arg0, %c16_i32 : i32
    %c16_i32_4 = arith.constant 16 : i32
    %9 = arith.addi %8, %c16_i32_4 : i32
    %c16_i32_5 = arith.constant 16 : i32
    %10 = arith.cmpi sle, %9, %c16_i32_5 : i32
    %11 = arith.extui %10 : i1 to i32
    %c0_i32_6 = arith.constant 0 : i32
    %12 = arith.cmpi ne, %11, %c0_i32_6 : i32
    scf.if %12 {
      %16 = vector.shape_cast %6 : vector<16x128xf32> to vector<2x8x128xf32>
      %cst = arith.constant dense<0.000000e+00> : vector<8x128xf32>
      %17 = vector.multi_reduction <add>, %16, %cst [0] : vector<2x8x128xf32> to vector<8x128xf32>
      %18 = vector.shape_cast %7 : vector<16x128xf32> to vector<2x8x128xf32>
      %cst_8 = arith.constant dense<0xFF800000> : vector<8x128xf32>
      %19 = vector.multi_reduction <maximumf>, %18, %cst_8 [0] : vector<2x8x128xf32> to vector<8x128xf32>
      %c0_9 = arith.constant 0 : index
      %c0_10 = arith.constant 0 : index
      %20 = vector.load %arg3[%c0_9, %c0_10] : memref<8x128xf32, #tpu.memory_space<vmem>>, vector<8x128xf32>
      %21 = arith.addf %20, %17 : vector<8x128xf32>
      %c0_11 = arith.constant 0 : index
      %c0_12 = arith.constant 0 : index
      %22 = vector.load %arg3[%c0_11, %c0_12] : memref<8x128xf32, #tpu.memory_space<vmem>>, vector<8x128xf32>
      tpu.vector_store %arg3[%c0_11, %c0_12], %21 {strides = array<i32>} : memref<8x128xf32, #tpu.memory_space<vmem>>, vector<8x128xf32>,
      %c0_13 = arith.constant 0 : index
      %c0_14 = arith.constant 0 : index
      %23 = vector.load %arg4[%c0_13, %c0_14] : memref<8x128xf32, #tpu.memory_space<vmem>>, vector<8x128xf32>
      %24 = arith.maximumf %23, %19 : vector<8x128xf32>
      %c0_15 = arith.constant 0 : index
      %c0_16 = arith.constant 0 : index
      %25 = vector.load %arg4[%c0_15, %c0_16] : memref<8x128xf32, #tpu.memory_space<vmem>>, vector<8x128xf32>
      tpu.vector_store %arg4[%c0_15, %c0_16], %24 {strides = array<i32>} : memref<8x128xf32, #tpu.memory_space<vmem>>, vector<8x128xf32>,
    } else {
    }
    %true = arith.constant true
    %13 = arith.xori %10, %true : i1
    %14 = arith.extui %13 : i1 to i32
    %c0_i32_7 = arith.constant 0 : i32
    %15 = arith.cmpi ne, %14, %c0_i32_7 : i32
    scf.if %15 {
      %16 = tpu.iota {dimensions = array<i32: 0>} : vector<16x128xi32>
      %17 = vector.broadcast %8 : i32 to vector<16x128xi32>
      %18 = arith.addi %17, %16 : vector<16x128xi32>
      %c16_i32_8 = arith.constant 16 : i32
      %19 = vector.broadcast %c16_i32_8 : i32 to vector<16x128xi32>
      %20 = arith.cmpi slt, %18, %19 : vector<16x128xi32>
      %cst = arith.constant 0.000000e+00 : f32
      %21 = vector.broadcast %cst : f32 to vector<16x128xf32>
      %22 = arith.select %20, %6, %21 : vector<16x128xi1>, vector<16x128xf32>
      %cst_9 = arith.constant 0.000000e+00 : f32
      %23 = vector.broadcast %cst_9 : f32 to vector<16x128xf32>
      %24 = arith.select %20, %7, %23 : vector<16x128xi1>, vector<16x128xf32>
      %25 = vector.shape_cast %22 : vector<16x128xf32> to vector<2x8x128xf32>
      %cst_10 = arith.constant dense<0.000000e+00> : vector<8x128xf32>
      %26 = vector.multi_reduction <add>, %25, %cst_10 [0] : vector<2x8x128xf32> to vector<8x128xf32>
      %27 = vector.shape_cast %24 : vector<16x128xf32> to vector<2x8x128xf32>
      %cst_11 = arith.constant dense<0xFF800000> : vector<8x128xf32>
      %28 = vector.multi_reduction <maximumf>, %27, %cst_11 [0] : vector<2x8x128xf32> to vector<8x128xf32>
      %c0_12 = arith.constant 0 : index
      %c0_13 = arith.constant 0 : index
      %29 = vector.load %arg3[%c0_12, %c0_13] : memref<8x128xf32, #tpu.memory_space<vmem>>, vector<8x128xf32>
      %30 = arith.addf %29, %26 : vector<8x128xf32>
      %c0_14 = arith.constant 0 : index
      %c0_15 = arith.constant 0 : index
      %31 = vector.load %arg3[%c0_14, %c0_15] : memref<8x128xf32, #tpu.memory_space<vmem>>, vector<8x128xf32>
      tpu.vector_store %arg3[%c0_14, %c0_15], %30 {strides = array<i32>} : memref<8x128xf32, #tpu.memory_space<vmem>>, vector<8x128xf32>,
      %c0_16 = arith.constant 0 : index
      %c0_17 = arith.constant 0 : index
      %32 = vector.load %arg4[%c0_16, %c0_17] : memref<8x128xf32, #tpu.memory_space<vmem>>, vector<8x128xf32>
      %33 = arith.maximumf %32, %28 : vector<8x128xf32>
      %c0_18 = arith.constant 0 : index
      %c0_19 = arith.constant 0 : index
      %34 = vector.load %arg4[%c0_18, %c0_19] : memref<8x128xf32, #tpu.memory_space<vmem>>, vector<8x128xf32>
      tpu.vector_store %arg4[%c0_18, %c0_19], %33 {strides = array<i32>} : memref<8x128xf32, #tpu.memory_space<vmem>>, vector<8x128xf32>,
    } else {
    }
    return
  }
  func.func @transform_0(%arg0: i32) -> (i32, i32) {
    %c0_i32 = arith.constant 0 : i32
    %c0_i32_0 = arith.constant 0 : i32
    return %arg0, %c0_i32 : i32, i32
  }
  func.func @transform_1(%arg0: i32) -> (i32, i32) {
    %c0_i32 = arith.constant 0 : i32
    %c0_i32_0 = arith.constant 0 : i32
    return %arg0, %c0_i32 : i32, i32
  }
  func.func @transform_2(%arg0: i32) -> (i32, i32) {
    %c0_i32 = arith.constant 0 : i32
    %c0_i32_0 = arith.constant 0 : i32
    %c0_i32_1 = arith.constant 0 : i32
    return %c0_i32, %c0_i32_0 : i32, i32
  }
  func.func @transform_3(%arg0: i32) -> (i32, i32) {
    %c0_i32 = arith.constant 0 : i32
    %c0_i32_0 = arith.constant 0 : i32
    %c0_i32_1 = arith.constant 0 : i32
    return %c0_i32, %c0_i32_0 : i32, i32
  }
}

</mosaic_0001>

<bundles_post_ra>
// kernel: tpu_custom_call.1
= control target key start
LH: loop header
LB: loop body
LE: loop exit
PB: predicated region body
PF: predicated region fallthrough
CT: control target
= control target key end

     0   :  { %9 = vsyncpa [#allocation3], 0  ;;  %s260_s0 = inlined_call_operand.hbm [shape: f32[16,128], index: 0, kind: input, shape index: {}]   ;;  %s261_s1 = inlined_call_operand.hbm [shape: f32[16,128], index: 1, kind: input, shape index: {}]   ;;  %s262_s2 = inlined_call_operand.hbm [shape: f32[8,128], index: 2, kind: output, shape index: {0}]   ;;  %s263_s3 = inlined_call_operand.hbm [shape: f32[8,128], index: 3, kind: output, shape index: {1}]  }
   0x1   :  { %10 = vsyncpa [#allocation6], 0 }
   0x2   :  { %11 = vsyncpa [#allocation4], 0 }
   0x3   :  { %12 = vsyncpa [#allocation9], 0  ;;  %s222_s12 = smov [#allocation2]  }
   0x4   :  { %s18_s13 = sshll.u32 %s222_s12, 4  ;;  %s19_s13 = int_to_ptr.vmem [resolvable:$true] %s18_s13 }
   0x5   :  { %s142_s14 = scalar_lea.vmem %s19_s13, 256  ;;  %p147_p1 = scmp.lt.s32.totalorder %s19_s13, %s19_s13 }
   0x6   :  { %p143_p0 = scmp.ne.s32.totalorder %s19_s13, %s142_s14  ;;  %p148_p2 = scmp.lt.s32.totalorder %s142_s14, %s142_s14 }
   0x8   :  { %p149_p3 = por %p148_p2, %p147_p1 }
   0xa   :  { %p150_p4 = pnand %p149_p3, %p143_p0 }
   0xc   :  { %153 = shalt.err (!%p150_p4)
}
   0xd   :  { %s223_s15 = smov 128   ;;  %s224_s16 = smov 8  }
   0xe   :  { %24 = dma.hbm_to_vmem [thread:$0]  %s260_s0, 256, %s19_s13, [#allocation3], %s223_s15, %s223_s15, %s224_s16  }
   0xf   :  { %s225_s19 = smov [#allocation5]  }
  0x10   :  { %s30_s20 = sshll.u32 %s225_s19, 4  ;;  %s31_s20 = int_to_ptr.vmem [resolvable:$true] %s30_s20 }
  0x11   :  { %s162_s21 = scalar_lea.vmem %s31_s20, 256  ;;  %p167_p6 = scmp.lt.s32.totalorder %s31_s20, %s31_s20 }
  0x12   :  { %p163_p5 = scmp.ne.s32.totalorder %s31_s20, %s162_s21  ;;  %p168_p7 = scmp.lt.s32.totalorder %s162_s21, %s162_s21 }
  0x14   :  { %p169_p8 = por %p168_p7, %p167_p6 }
  0x16   :  { %p170_p9 = pnand %p169_p8, %p163_p5 }
  0x18   :  { %173 = shalt.err (!%p170_p9)
}
  0x19   :  { %36 = dma.hbm_to_vmem [thread:$0]  %s261_s1, 256, %s31_s20, [#allocation6], %s223_s15, %s223_s15, %s224_s16  }
  0x1a   :  { %214 = dma.done.wait [#allocation3], 256  }
  0x1b   :  { %215 = vsyncadd [#allocation3], 4294967040 }
  0x1c   :  { %216 = dma.done.wait [#allocation6], 256  }
  0x1d   :  { %217 = vsyncadd [#allocation6], 4294967040  ;;  %v49_v0 = vld [vmem:[#allocation2] sm:$0xff]  ;;  %v50_v1 = vld [vmem:[#allocation2 + $0x8] sm:$0xff]  ;;  %s226_s0 = smov [#allocation7]   ;;  %s227_s25 = smov [#allocation8]  }
  0x1e   :  { %v51_v2 = vld [vmem:[#allocation5] sm:$0xff]  ;;  %v52_v3 = vld [vmem:[#allocation5 + $0x8] sm:$0xff]  ;;  %s103_s24 = sshll.u32 %s226_s0, 4  ;;  %s113_s1 = sshll.u32 %s227_s25, 4  ;;  %s104_s24 = int_to_ptr.vmem [resolvable:$true] %s103_s24  ;;  %s114_s1 = int_to_ptr.vmem [resolvable:$true] %s113_s1 }
  0x1f   :  { %v53_v4 = vsub.f32 %v49_v0, %v51_v2  ;;  %v54_v5 = vsub.f32 %v50_v1, %v52_v3  ;;  %s174_s26 = scalar_lea.vmem %s104_s24, 128  ;;  %p179_p11 = scmp.lt.s32.totalorder %s104_s24, %s104_s24 }
  0x20   :  { %p175_p10 = scmp.ne.s32.totalorder %s104_s24, %s174_s26  ;;  %p180_p12 = scmp.lt.s32.totalorder %s174_s26, %s174_s26 }
  0x21   :  { %v55_v6 = vmul.f32 %v53_v4, %v53_v4  ;;  %v57_v7 = vand.u32 2147483647, %v53_v4  ;;  %v56_v8 = vmul.f32 %v54_v5, %v54_v5  ;;  %v58_v9 = vand.u32 2147483647, %v54_v5 }
  0x22   :  { %p181_p13 = por %p180_p12, %p179_p11 }
  0x23   :  { %v65_v10 = vadd.f32 %v56_v8, %v55_v6  ;;  %v66_v11 = vmax.f32.f32 %v57_v7, %v58_v9 }
  0x24   :  { %p182_p0 = pnand %p181_p13, %p175_p10 }
  0x25   :  { %v71_v12 = vmax.f32 %v66_v11, 0.0  ;;  %69 = vst [vmem:[#allocation7] sm:$0xff] %v65_v10 }
  0x27   :  { %72 = vst [vmem:[#allocation8] sm:$0xff] %v71_v12 }
  0x28   :  { %185 = shalt.err (!%p182_p0)
}
  0x29   :  { %106 = dma.vmem_to_hbm [thread:$0]  %s104_s24, 128, %s262_s2, [#allocation4]  }
  0x2a   :  { %s194_s29 = scalar_lea.vmem %s114_s1, 128  ;;  %p199_p2 = scmp.lt.s32.totalorder %s114_s1, %s114_s1 }
  0x2b   :  { %p195_p1 = scmp.ne.s32.totalorder %s114_s1, %s194_s29  ;;  %p200_p3 = scmp.lt.s32.totalorder %s194_s29, %s194_s29 }
  0x2d   :  { %p201_p4 = por %p200_p3, %p199_p2 }
  0x2f   :  { %p202_p5 = pnand %p201_p4, %p195_p1 }
  0x31   :  { %205 = shalt.err (!%p202_p5)
}
  0x32   :  { %116 = dma.vmem_to_hbm [thread:$0]  %s114_s1, 128, %s263_s3, [#allocation9]  }
  0x33   :  { %218 = dma.done.wait [#allocation4], 128  }
  0x34   :  { %219 = vsyncadd [#allocation4], 4294967168 }
  0x35   :  { %220 = dma.done.wait [#allocation9], 128  }
  0x36   :  { %221 = vsyncadd [#allocation9], 4294967168 }
  0x37   :  { %123 = vsyncpa [#allocation3], 1 }
  0x38   :  { %124 = vsyncpa [#allocation6], 1 }
  0x39   :  { %125 = vsyncpa [#allocation4], 1 }
  0x3a   :  { %126 = vsyncpa [#allocation9], 1 }

</bundles_post_ra>
